<compile_context>
chip_gen: v7x
topology: tpu7x:2x2x1
jax: 0.10.0
libtpu: 0.0.40
codegen_flags: <defaults>
</compile_context>

<pallas_src>
import jax
import jax.numpy as jnp
from jax.experimental import pallas as pl
from jax.experimental.pallas import tpu as pltpu

BN_EPS = 1e-5


def _round_up(x, m):
    return (x + m - 1) // m * m


def _pick_lane_tile(total):
    # total is always a multiple of 128 here.
    for cand in (2048, 1024, 512, 256, 128):
        if total % cand == 0:
            return cand
    return total


def _vmem_limit(nbytes):
    # Explicit double-buffered budget with headroom, never above the 32 MiB
    # scoped default (safe on v7x's 64 MiB physical VMEM as well).
    return int(min(max(2 * nbytes, 16 * 1024 * 1024), 32 * 1024 * 1024))


# --------------------- Pass 1: per-feature batch statistics ---------------------
def _make_stats_kernel(srows, fold):
    def bn_stats_kernel(x_ref, s1_ref, s2_ref, acc1, acc2):
        # grid = (F tiles [parallel], N tiles [arbitrary/reduction, innermost])
        n = pl.program_id(1)

        @pl.when(n == 0)
        def _():
            acc1[...] = jnp.zeros_like(acc1)
            acc2[...] = jnp.zeros_like(acc2)

        x = x_ref[...].astype(jnp.float32)                 # (tm, tk)
        if fold > 1:
            # Pure VPU adds: fold row groups of 8 into the (8, tk) scratch.
            xr = x.reshape(fold, srows, x.shape[-1])
            acc1[...] += xr.sum(axis=0)
            acc2[...] += (xr * xr).sum(axis=0)
        else:
            acc1[...] += x
            acc2[...] += x * x

        # Cross-sublane (XLU) reduce only once per feature tile.
        @pl.when(n == pl.num_programs(1) - 1)
        def _():
            s1_ref[...] = acc1[...].sum(axis=0, keepdims=True)
            s2_ref[...] = acc2[...].sum(axis=0, keepdims=True)

    return bn_stats_kernel


# --------------------- Pass 2: BN-folded tiled Linear (MXU) ---------------------
def _make_linear_kernel():
    def bn_linear_kernel(x_ref, scale_ref, w_ref, be_ref, o_ref):
        # grid = (M tiles [parallel], class tiles [parallel], F tiles [arbitrary])
        k = pl.program_id(2)

        # Output block is resident across k (index_map ignores k): initialize
        # it with the folded bias (shift @ W^T + b) and accumulate directly.
        @pl.when(k == 0)
        def _():
            o_ref[...] = jnp.broadcast_to(be_ref[...], o_ref.shape)

        # BN scale vector lives resident in VMEM; grab the k-th tile's row.
        sc = scale_ref[pl.ds(k, 1), :]                      # (1, tk) f32
        xm = (x_ref[...].astype(jnp.float32) * sc).astype(jnp.bfloat16)

        # Canonical dot: weight already transposed/padded/cast in the wrapper,
        # so the (tk, tn) bf16 block feeds the MXU with no in-kernel transpose.
        o_ref[...] += jnp.dot(xm, w_ref[...],
                              preferred_element_type=jnp.float32)

    return bn_linear_kernel


@jax.jit
def classifier_forward(x_nchw, gamma, beta, weight, bias):
    """x_nchw: (N, C, H, W); gamma/beta: (C,); weight: (K, C*H*W) torch Linear
    layout; bias: (K,).  Returns (N, K) float32 logits."""
    N, C, H, W = x_nchw.shape
    HW = H * W
    F = C * HW
    K = weight.shape[0]

    # ---- lane/sublane-aligned geometry (pad only when actually required) ----
    HWp = _round_up(HW, 128)
    Fp = C * HWp
    Kp = _round_up(K, 128)

    if N <= 256:
        # A single full-extent batch block is legal (block dim == array dim):
        # no batch padding, no padded HBM copy of x.
        Np, tm = N, N
    else:
        tm = 256
        Np = _round_up(N, tm)

    tk = _pick_lane_tile(Fp)                       # feature (reduction) tile
    # Prefer 256-wide class tiles on the 256x256 MXU, but keep >=2 class
    # blocks when possible so both v7x TensorCores get parallel work.
    tn = 256 if (Kp % 256 == 0 and Kp >= 512) else 128
    n_kb = Fp // tk

    # ---- x layout: channel-major flatten; pad only if needed ----
    if HWp == HW:
        x2d = x_nchw.reshape(N, F)                 # free reshape, no HBM copy
    else:
        x2d = jnp.pad(x_nchw.reshape(N, C, HW),
                      ((0, 0), (0, 0), (0, HWp - HW))).reshape(N, Fp)
    if Np != N:
        x2d = jnp.pad(x2d, ((0, Np - N), (0, 0)))
    x_f32 = x2d.astype(jnp.float32)                # stats read f32
    x_bf16 = x2d.astype(jnp.bfloat16)              # halves pass-2 HBM read

    # ---------------- Pass 1: batch statistics ----------------
    if tm % 8 == 0:
        srows, fold = 8, tm // 8
    else:
        srows, fold = tm, 1
    vmem1 = _vmem_limit(2 * tm * tk * 4 + 2 * srows * tk * 4 + 4 * tk * 4)
    sum_pf, sumsq_pf = pl.pallas_call(
        _make_stats_kernel(srows, fold),
        out_shape=(jax.ShapeDtypeStruct((1, Fp), jnp.float32),
                   jax.ShapeDtypeStruct((1, Fp), jnp.float32)),
        grid=(Fp // tk, Np // tm),
        in_specs=[pl.BlockSpec((tm, tk), lambda f, n: (n, f))],
        out_specs=(pl.BlockSpec((1, tk), lambda f, n: (0, f)),
                   pl.BlockSpec((1, tk), lambda f, n: (0, f))),
        scratch_shapes=[pltpu.VMEM((srows, tk), jnp.float32),
                        pltpu.VMEM((srows, tk), jnp.float32)],
        compiler_params=pltpu.CompilerParams(
            dimension_semantics=("parallel", "arbitrary"),
            vmem_limit_bytes=vmem1),
    )(x_f32)

    # Tiny per-channel finalize (O(C) work) in the wrapper.
    count = jnp.float32(N * HW)                    # real (unpadded) count
    s1_c = sum_pf.reshape(C, HWp).sum(axis=1)
    s2_c = sumsq_pf.reshape(C, HWp).sum(axis=1)
    mean_c = s1_c / count
    # TODO(synk): E[x^2]-E[x]^2 can catastrophically cancel for huge N*H*W with
    # |mean| >> std; switch to a shifted/two-pass accumulation if that matters.
    var_c = jnp.maximum(s2_c / count - mean_c * mean_c, 0.0)
    inv_std_c = jax.lax.rsqrt(var_c + BN_EPS)
    scale_c = gamma.astype(jnp.float32) * inv_std_c
    shift_c = beta.astype(jnp.float32) - mean_c * scale_c

    # Per-feature scale, shaped (n_kb, tk) so the pass-2 kernel can keep the
    # whole vector resident in VMEM and index the k-th row.
    scale_f = jnp.broadcast_to(scale_c[:, None], (C, HWp)).reshape(n_kb, tk)

    # Fold the BN shift into an effective bias: (x*s + t) @ W^T + b
    #   = (x*s) @ W^T + (t @ W^T + b).  Trivial (1,F)x(F,K) matvec in XLA.
    shift_feat = jnp.broadcast_to(shift_c[:, None], (C, HW)).reshape(F)
    bias_eff = shift_feat @ weight.astype(jnp.float32).T + bias.astype(jnp.float32)
    bias_eff = jnp.pad(bias_eff, (0, Kp - K)).reshape(1, Kp)

    # Weight prep: pad features (if needed), transpose to (F, K), pad classes,
    # cast to bf16 -- one fused materialization; pure function of the params
    # (hoist/cache it once in production).
    if HWp == HW:
        w_kf = weight
    else:
        w_kf = jnp.pad(weight.reshape(K, C, HW),
                       ((0, 0), (0, 0), (0, HWp - HW))).reshape(K, Fp)
    w_fk = jnp.pad(w_kf.T, ((0, 0), (0, Kp - K))).astype(jnp.bfloat16)  # (Fp, Kp)

    # ---------------- Pass 2: BN-folded Linear ----------------
    vmem2 = _vmem_limit(2 * (tm * tk * 2 + tk * tn * 2 + tm * tn * 4 + tn * 4)
                        + Fp * 4)
    out_p = pl.pallas_call(
        _make_linear_kernel(),
        out_shape=jax.ShapeDtypeStruct((Np, Kp), jnp.float32),
        grid=(Np // tm, Kp // tn, Fp // tk),
        in_specs=[
            pl.BlockSpec((tm, tk), lambda i, j, k: (i, k)),     # x (bf16)
            pl.BlockSpec((n_kb, tk), lambda i, j, k: (0, 0)),   # BN scale, resident
            pl.BlockSpec((tk, tn), lambda i, j, k: (k, j)),     # W (F, K) bf16
            pl.BlockSpec((1, tn), lambda i, j, k: (0, j)),      # folded bias
        ],
        out_specs=pl.BlockSpec((tm, tn), lambda i, j, k: (i, j)),
        compiler_params=pltpu.CompilerParams(
            dimension_semantics=("parallel", "parallel", "arbitrary"),
            vmem_limit_bytes=vmem2),
    )(x_bf16, scale_f, w_fk, bias_eff)

    return out_p[:N, :K]


def classifier_reference(x_nchw, gamma, beta, weight, bias):
    """Pure-JAX reference mirroring the PyTorch forward (training-mode BN)."""
    mean = jnp.mean(x_nchw, axis=(0, 2, 3), keepdims=True)
    var = jnp.mean((x_nchw - mean) ** 2, axis=(0, 2, 3), keepdims=True)
    xn = (x_nchw - mean) / jnp.sqrt(var + BN_EPS)
    xn = xn * gamma.reshape(1, -1, 1, 1) + beta.reshape(1, -1, 1, 1)
    xf = xn.reshape(x_nchw.shape[0], -1)
    return xf @ weight.T + bias


if __name__ == "__main__":
    # Small shapes consistent with the module: N=2, C=4, H=W=16, nb_classes=10
    N, C, H, W = 2, 4, 16, 16
    K = 10
    F_feat = C * H * W

    key = jax.random.PRNGKey(0)
    kx, kw, kb, kg, kbt = jax.random.split(key, 5)

    x = jax.random.normal(kx, (N, C, H, W), dtype=jnp.float32)

    # Affine BN params (random, to exercise the folded scale/shift path) and
    # PyTorch-default Linear init bounds.
    gamma = 1.0 + 0.1 * jax.random.normal(kg, (C,), dtype=jnp.float32)
    beta = 0.1 * jax.random.normal(kbt, (C,), dtype=jnp.float32)
    bound = 1.0 / (F_feat ** 0.5)
    weight = jax.random.uniform(kw, (K, F_feat), jnp.float32, -bound, bound)
    bias = jax.random.uniform(kb, (K,), jnp.float32, -bound, bound)

    out = classifier_forward(x, gamma, beta, weight, bias)
    out = jax.block_until_ready(out)

    ref = classifier_reference(x, gamma, beta, weight, bias)
    assert out.shape == (N, K)
    max_err = jnp.max(jnp.abs(out - ref))
    # bf16 pass-2 operands: expect ~3e-3 relative error on these magnitudes.
    assert jnp.allclose(out, ref, rtol=2e-2, atol=1e-2), \
        f"mismatch: max abs err {max_err}"

    print("KERNEL_OK")
</pallas_src>

<mosaic_0001>
module attributes {stable_mosaic.version = 11 : i64} {
  func.func @bn_stats_kernel(%arg0: i32, %arg1: i32, %arg2: memref<2x1024xf32, #tpu.memory_space<vmem>>, %arg3: memref<1x1024xf32, #tpu.memory_space<vmem>>, %arg4: memref<1x1024xf32, #tpu.memory_space<vmem>>, %arg5: memref<2x1024xf32, #tpu.memory_space<vmem>>, %arg6: memref<2x1024xf32, #tpu.memory_space<vmem>>) attributes {dimension_semantics = [#tpu.dimension_semantics<parallel>, #tpu.dimension_semantics<arbitrary>], iteration_bounds = array<i64: 1, 1>, scalar_prefetch = 0 : i64, scratch_operands = 2 : i64, tpu.core_type = #tpu.core_type<tc>, window_params = [{transform_indices = @transform_0, window_bounds = array<i64: 2, 1024>}, {transform_indices = @transform_1, window_bounds = array<i64: 1, 1024>}, {transform_indices = @transform_2, window_bounds = array<i64: 1, 1024>}]} {
    %c0_i32 = arith.constant 0 : i32
    %0 = arith.cmpi eq, %arg1, %c0_i32 : i32
    %1 = arith.extui %0 : i1 to i32
    %c0_i32_0 = arith.constant 0 : i32
    %2 = arith.cmpi ne, %1, %c0_i32_0 : i32
    scf.if %2 {
      %cst = arith.constant 0.000000e+00 : f32
      %14 = vector.broadcast %cst : f32 to vector<2x1024xf32>
      %c0_12 = arith.constant 0 : index
      %c0_13 = arith.constant 0 : index
      %15 = vector.load %arg5[%c0_12, %c0_13] : memref<2x1024xf32, #tpu.memory_space<vmem>>, vector<2x1024xf32>
      tpu.vector_store %arg5[%c0_12, %c0_13], %14 {strides = array<i32>} : memref<2x1024xf32, #tpu.memory_space<vmem>>, vector<2x1024xf32>,
      %cst_14 = arith.constant 0.000000e+00 : f32
      %16 = vector.broadcast %cst_14 : f32 to vector<2x1024xf32>
      %c0_15 = arith.constant 0 : index
      %c0_16 = arith.constant 0 : index
      %17 = vector.load %arg6[%c0_15, %c0_16] : memref<2x1024xf32, #tpu.memory_space<vmem>>, vector<2x1024xf32>
      tpu.vector_store %arg6[%c0_15, %c0_16], %16 {strides = array<i32>} : memref<2x1024xf32, #tpu.memory_space<vmem>>, vector<2x1024xf32>,
    } else {
    }
    %c0 = arith.constant 0 : index
    %c0_1 = arith.constant 0 : index
    %3 = vector.load %arg2[%c0, %c0_1] : memref<2x1024xf32, #tpu.memory_space<vmem>>, vector<2x1024xf32>
    %c0_2 = arith.constant 0 : index
    %c0_3 = arith.constant 0 : index
    %4 = vector.load %arg5[%c0_2, %c0_3] : memref<2x1024xf32, #tpu.memory_space<vmem>>, vector<2x1024xf32>
    %5 = arith.addf %4, %3 : vector<2x1024xf32>
    %c0_4 = arith.constant 0 : index
    %c0_5 = arith.constant 0 : index
    %6 = vector.load %arg5[%c0_4, %c0_5] : memref<2x1024xf32, #tpu.memory_space<vmem>>, vector<2x1024xf32>
    tpu.vector_store %arg5[%c0_4, %c0_5], %5 {strides = array<i32>} : memref<2x1024xf32, #tpu.memory_space<vmem>>, vector<2x1024xf32>,
    %c0_6 = arith.constant 0 : index
    %c0_7 = arith.constant 0 : index
    %7 = vector.load %arg6[%c0_6, %c0_7] : memref<2x1024xf32, #tpu.memory_space<vmem>>, vector<2x1024xf32>
    %8 = arith.mulf %3, %3 : vector<2x1024xf32>
    %9 = arith.addf %7, %8 : vector<2x1024xf32>
    %c0_8 = arith.constant 0 : index
    %c0_9 = arith.constant 0 : index
    %10 = vector.load %arg6[%c0_8, %c0_9] : memref<2x1024xf32, #tpu.memory_space<vmem>>, vector<2x1024xf32>
    tpu.vector_store %arg6[%c0_8, %c0_9], %9 {strides = array<i32>} : memref<2x1024xf32, #tpu.memory_space<vmem>>, vector<2x1024xf32>,
    %c0_i32_10 = arith.constant 0 : i32
    %11 = arith.cmpi eq, %arg1, %c0_i32_10 : i32
    %12 = arith.extui %11 : i1 to i32
    %c0_i32_11 = arith.constant 0 : i32
    %13 = arith.cmpi ne, %12, %c0_i32_11 : i32
    scf.if %13 {
      %c0_12 = arith.constant 0 : index
      %c0_13 = arith.constant 0 : index
      %14 = vector.load %arg5[%c0_12, %c0_13] : memref<2x1024xf32, #tpu.memory_space<vmem>>, vector<2x1024xf32>
      %cst = arith.constant dense<0.000000e+00> : vector<1024xf32>
      %15 = vector.multi_reduction <add>, %14, %cst [0] : vector<2x1024xf32> to vector<1024xf32>
      %16 = vector.shape_cast %15 : vector<1024xf32> to vector<1x1024xf32>
      %c0_14 = arith.constant 0 : index
      %c0_15 = arith.constant 0 : index
      %17 = vector.load %arg3[%c0_14, %c0_15] : memref<1x1024xf32, #tpu.memory_space<vmem>>, vector<1x1024xf32>
      tpu.vector_store %arg3[%c0_14, %c0_15], %16 {strides = array<i32>} : memref<1x1024xf32, #tpu.memory_space<vmem>>, vector<1x1024xf32>,
      %c0_16 = arith.constant 0 : index
      %c0_17 = arith.constant 0 : index
      %18 = vector.load %arg6[%c0_16, %c0_17] : memref<2x1024xf32, #tpu.memory_space<vmem>>, vector<2x1024xf32>
      %cst_18 = arith.constant dense<0.000000e+00> : vector<1024xf32>
      %19 = vector.multi_reduction <add>, %18, %cst_18 [0] : vector<2x1024xf32> to vector<1024xf32>
      %20 = vector.shape_cast %19 : vector<1024xf32> to vector<1x1024xf32>
      %c0_19 = arith.constant 0 : index
      %c0_20 = arith.constant 0 : index
      %21 = vector.load %arg4[%c0_19, %c0_20] : memref<1x1024xf32, #tpu.memory_space<vmem>>, vector<1x1024xf32>
      tpu.vector_store %arg4[%c0_19, %c0_20], %20 {strides = array<i32>} : memref<1x1024xf32, #tpu.memory_space<vmem>>, vector<1x1024xf32>,
    } else {
    }
    return
  }
  func.func @transform_0(%arg0: i32, %arg1: i32) -> (i32, i32) {
    %c0_i32 = arith.constant 0 : i32
    return %arg1, %arg0 : i32, i32
  }
  func.func @transform_1(%arg0: i32, %arg1: i32) -> (i32, i32) {
    %c0_i32 = arith.constant 0 : i32
    %c0_i32_0 = arith.constant 0 : i32
    return %c0_i32, %arg0 : i32, i32
  }
  func.func @transform_2(%arg0: i32, %arg1: i32) -> (i32, i32) {
    %c0_i32 = arith.constant 0 : i32
    %c0_i32_0 = arith.constant 0 : i32
    return %c0_i32, %arg0 : i32, i32
  }
}

module attributes {stable_mosaic.version = 11 : i64} {
  func.func @bn_linear_kernel(%arg0: i32, %arg1: i32, %arg2: i32, %arg3: memref<2x1024xbf16, #tpu.memory_space<vmem>>, %arg4: memref<1x1024xf32, #tpu.memory_space<vmem>>, %arg5: memref<1024x128xbf16, #tpu.memory_space<vmem>>, %arg6: memref<1x128xf32, #tpu.memory_space<vmem>>, %arg7: memref<2x128xf32, #tpu.memory_space<vmem>>) attributes {dimension_semantics = [#tpu.dimension_semantics<parallel>, #tpu.dimension_semantics<parallel>, #tpu.dimension_semantics<arbitrary>], iteration_bounds = array<i64: 1, 1, 1>, scalar_prefetch = 0 : i64, scratch_operands = 0 : i64, tpu.core_type = #tpu.core_type<tc>, window_params = [{transform_indices = @transform_0, window_bounds = array<i64: 2, 1024>}, {pipeline_mode = #tpu.pipeline_mode<synchronous>, transform_indices = @transform_1, window_bounds = array<i64: 1, 1024>}, {transform_indices = @transform_2, window_bounds = array<i64: 1024, 128>}, {transform_indices = @transform_3, window_bounds = array<i64: 1, 128>}, {transform_indices = @transform_4, window_bounds = array<i64: 2, 128>}]} {
    %c0_i32 = arith.constant 0 : i32
    %0 = arith.cmpi eq, %arg2, %c0_i32 : i32
    %1 = arith.extui %0 : i1 to i32
    %c0_i32_0 = arith.constant 0 : i32
    %2 = arith.cmpi ne, %1, %c0_i32_0 : i32
    scf.if %2 {
      %c0_9 = arith.constant 0 : index
      %c0_10 = arith.constant 0 : index
      %15 = vector.load %arg6[%c0_9, %c0_10] : memref<1x128xf32, #tpu.memory_space<vmem>>, vector<1x128xf32>
      %16 = vector.shape_cast %15 : vector<1x128xf32> to vector<1x128xf32>
      %17 = vector.broadcast %16 : vector<1x128xf32> to vector<2x128xf32>
      %c0_11 = arith.constant 0 : index
      %c0_12 = arith.constant 0 : index
      %18 = vector.load %arg7[%c0_11, %c0_12] : memref<2x128xf32, #tpu.memory_space<vmem>>, vector<2x128xf32>
      tpu.vector_store %arg7[%c0_11, %c0_12], %17 {strides = array<i32>} : memref<2x128xf32, #tpu.memory_space<vmem>>, vector<2x128xf32>,
    } else {
    }
    %3 = arith.index_cast %arg2 : i32 to index
    %c0 = arith.constant 0 : index
    %4 = vector.load %arg4[%3, %c0] : memref<1x1024xf32, #tpu.memory_space<vmem>>, vector<1x1024xf32>
    %c0_1 = arith.constant 0 : index
    %c0_2 = arith.constant 0 : index
    %5 = vector.load %arg3[%c0_1, %c0_2] : memref<2x1024xbf16, #tpu.memory_space<vmem>>, vector<2x1024xbf16>
    %6 = arith.extf %5 : vector<2x1024xbf16> to vector<2x1024xf32>
    %7 = vector.broadcast %4 : vector<1x1024xf32> to vector<2x1024xf32>
    %8 = arith.mulf %6, %7 : vector<2x1024xf32>
    %9 = arith.truncf %8 : vector<2x1024xf32> to vector<2x1024xbf16>
    %c0_3 = arith.constant 0 : index
    %c0_4 = arith.constant 0 : index
    %10 = vector.load %arg7[%c0_3, %c0_4] : memref<2x128xf32, #tpu.memory_space<vmem>>, vector<2x128xf32>
    %c0_5 = arith.constant 0 : index
    %c0_6 = arith.constant 0 : index
    %11 = vector.load %arg5[%c0_5, %c0_6] : memref<1024x128xbf16, #tpu.memory_space<vmem>>, vector<1024x128xbf16>
    %cst = arith.constant dense<0.000000e+00> : vector<2x128xf32>
    %12 = tpu.matmul %9, %11, %cst {dimension_numbers = #tpu.dot_dimension_numbers<[1], [0], [0], [1], [0, 0, 1, 1], [], []>} : vector<2x1024xbf16>, vector<1024x128xbf16>, vector<2x128xf32> -> vector<2x128xf32>
    %13 = arith.addf %10, %12 : vector<2x128xf32>
    %c0_7 = arith.constant 0 : index
    %c0_8 = arith.constant 0 : index
    %14 = vector.load %arg7[%c0_7, %c0_8] : memref<2x128xf32, #tpu.memory_space<vmem>>, vector<2x128xf32>
    tpu.vector_store %arg7[%c0_7, %c0_8], %13 {strides = array<i32>} : memref<2x128xf32, #tpu.memory_space<vmem>>, vector<2x128xf32>,
    return
  }
  func.func @transform_0(%arg0: i32, %arg1: i32, %arg2: i32) -> (i32, i32) {
    %c0_i32 = arith.constant 0 : i32
    return %arg0, %arg2 : i32, i32
  }
  func.func @transform_1(%arg0: i32, %arg1: i32, %arg2: i32) -> (i32, i32) {
    %c0_i32 = arith.constant 0 : i32
    %c0_i32_0 = arith.constant 0 : i32
    %c0_i32_1 = arith.constant 0 : i32
    return %c0_i32, %c0_i32_0 : i32, i32
  }
  func.func @transform_2(%arg0: i32, %arg1: i32, %arg2: i32) -> (i32, i32) {
    %c0_i32 = arith.constant 0 : i32
    return %arg2, %arg1 : i32, i32
  }
  func.func @transform_3(%arg0: i32, %arg1: i32, %arg2: i32) -> (i32, i32) {
    %c0_i32 = arith.constant 0 : i32
    %c0_i32_0 = arith.constant 0 : i32
    return %c0_i32, %arg1 : i32, i32
  }
  func.func @transform_4(%arg0: i32, %arg1: i32, %arg2: i32) -> (i32, i32) {
    %c0_i32 = arith.constant 0 : i32
    return %arg0, %arg1 : i32, i32
  }
}

</mosaic_0001>

<bundles_post_ra>
// kernel: classifier_forward.2
= control target key start
LH: loop header
LB: loop body
LE: loop exit
PB: predicated region body
PF: predicated region fallthrough
CT: control target
= control target key end

     0   :  { %v45_v0 = vlaneseq  ;;  %v372_v3 = vmov 1983009808   ;;  %v373_v5 = vmov 1966171168   ;;  %vm83_vm0 = vcmask 1041408   ;;  %s451_s0 = inlined_call_operand.vmem [shape: f32[2,1024], index: 0, kind: input, shape index: {}]   ;;  %s452_s1 = inlined_call_operand.vmem [shape: f32[1,1024], index: 1, kind: output, shape index: {0}]   ;;  %s453_s2 = inlined_call_operand.vmem [shape: f32[1,1024], index: 2, kind: output, shape index: {1}]  }
   0x1   :  { %v18_v1 = vld [vmem:[%s451_s0] sm:$0xff]  ;;  %v19_v2 = vld [vmem:[%s451_s0 + $0x8] sm:$0xff]  ;;  %v43_v4 = vunpack.c.l.s4 %v372_v3  ;;  %v153_v6 = vunpack.c.l.s4 %v373_v5 }
   0x2   :  { %v28_v7 = vmul.f32 %v18_v1, %v18_v1  ;;  %v29_v8 = vmul.f32 %v19_v2, %v19_v2  ;;  %v46_v9 = vshrl.u32 %v45_v0, 7  ;;  %v41_v10 = vcombine.high %v18_v1, %v18_v1 }
   0x3   :  { %v44_v11 = vunpack.c.0.s8 %v43_v4  ;;  %v58_v12 = vcombine.high %v19_v2, %v19_v2  ;;  %v154_v13 = vunpack.c.0.s8 %v153_v6 }
   0x4   :  { %v203_v14 = vcombine.high %v28_v7, %v28_v7  ;;  %v220_v15 = vcombine.high %v29_v8, %v29_v8 }
   0x5   :  { %v47_v16 = vsub.s32 %v44_v11, %v46_v9  ;;  %v395_v17 = vsub.s32 %v154_v13, %v46_v9 }
   0x7   :  { %v48_v18 = vrot.slane %v18_v1, %v47_v16  ;;  %v55_v19 = vrot.slane %v41_v10, %v47_v16  ;;  %v65_v20 = vrot.slane %v19_v2, %v47_v16  ;;  %v72_v21 = vrot.slane %v58_v12, %v47_v16 }
   0x8   :  { %v397_v22 = vrot.slane %v28_v7, %v47_v16  ;;  %v399_v23 = vrot.slane %v203_v14, %v47_v16  ;;  %v401_v24 = vrot.slane %v29_v8, %v47_v16  ;;  %v403_v25 = vrot.slane %v220_v15, %v47_v16 }
   0x9   :  { %v56_v26 = vcombine.high %v48_v18, %v48_v18  ;;  %v57_v27 = vcombine.high %v55_v19, %v55_v19  ;;  %v73_v28 = vcombine.high %v65_v20, %v65_v20  ;;  %v74_v29 = vcombine.high %v72_v21, %v72_v21 }
   0xa   :  { %v84_v30 = vsel %vm83_vm0, %v48_v18, 0.0  ;;  %v98_v31 = vsel %vm83_vm0, %v55_v19, 0.0  ;;  %v112_v32 = vsel %vm83_vm0, %v65_v20, 0.0  ;;  %v126_v33 = vsel %vm83_vm0, %v72_v21, 0.0 }
   0xb   :  { %v85_v34 = vrot.slane %v84_v30, 4  ;;  %v91_v35 = vsel %vm83_vm0, %v56_v26, 0.0  ;;  %v99_v36 = vrot.slane %v98_v31, 4  ;;  %v105_v37 = vsel %vm83_vm0, %v57_v27, 0.0 }
   0xc   :  { %v92_v38 = vrot.slane %v91_v35, 4  ;;  %v106_v39 = vrot.slane %v105_v37, 4  ;;  %v113_v40 = vrot.slane %v112_v32, 4  ;;  %v119_v41 = vsel %vm83_vm0, %v73_v28, 0.0 }
   0xd   :  { %v86_v42 = vadd.f32 %v85_v34, %v84_v30  ;;  %v100_v43 = vadd.f32 %v99_v36, %v98_v31  ;;  %v120_v44 = vrot.slane %v119_v41, 4  ;;  %v127_v45 = vrot.slane %v126_v33, 4 }
   0xe   :  { %v93_v46 = vadd.f32 %v92_v38, %v91_v35  ;;  %v107_v47 = vadd.f32 %v106_v39, %v105_v37  ;;  %v114_v48 = vadd.f32 %v113_v40, %v112_v32  ;;  %v133_v49 = vsel %vm83_vm0, %v74_v29, 0.0 }
   0xf   :  { %v87_v50 = vrot.slane %v86_v42, 2  ;;  %v101_v51 = vrot.slane %v100_v43, 2  ;;  %v121_v52 = vadd.f32 %v120_v44, %v119_v41  ;;  %v128_v53 = vadd.f32 %v127_v45, %v126_v33 }
  0x10   :  { %v94_v54 = vrot.slane %v93_v46, 2  ;;  %v108_v55 = vrot.slane %v107_v47, 2  ;;  %v115_v56 = vrot.slane %v114_v48, 2  ;;  %v134_v57 = vrot.slane %v133_v49, 4 }
  0x11   :  { %v88_v58 = vadd.f32 %v87_v50, %v86_v42  ;;  %v102_v59 = vadd.f32 %v101_v51, %v100_v43  ;;  %v122_v60 = vrot.slane %v121_v52, 2  ;;  %v129_v61 = vrot.slane %v128_v53, 2 }
  0x12   :  { %v95_v62 = vadd.f32 %v94_v54, %v93_v46  ;;  %v109_v63 = vadd.f32 %v108_v55, %v107_v47  ;;  %v116_v0 = vadd.f32 %v115_v56, %v114_v48  ;;  %v135_v1 = vadd.f32 %v134_v57, %v133_v49 }
  0x13   :  { %v89_v2 = vrot.slane %v88_v58, 1  ;;  %v103_v3 = vrot.slane %v102_v59, 1  ;;  %v123_v4 = vadd.f32 %v122_v60, %v121_v52  ;;  %v130_v5 = vadd.f32 %v129_v61, %v128_v53 }
  0x14   :  { %v96_v6 = vrot.slane %v95_v62, 1  ;;  %v110_v7 = vrot.slane %v109_v63, 1  ;;  %v117_v8 = vrot.slane %v116_v0, 1  ;;  %v136_v9 = vrot.slane %v135_v1, 2 }
  0x15   :  { %v90_v10 = vadd.f32 %v89_v2, %v88_v58  ;;  %v104_v11 = vadd.f32 %v103_v3, %v102_v59  ;;  %v124_v12 = vrot.slane %v123_v4, 1  ;;  %v131_v13 = vrot.slane %v130_v5, 1 }
  0x16   :  { %v97_v14 = vadd.f32 %v96_v6, %v95_v62  ;;  %v111_v15 = vadd.f32 %v110_v7, %v109_v63  ;;  %v118_v16 = vadd.f32 %v117_v8, %v116_v0  ;;  %v137_v18 = vadd.f32 %v136_v9, %v135_v1 }
  0x17   :  { %v125_v19 = vadd.f32 %v124_v12, %v123_v4  ;;  %v132_v20 = vadd.f32 %v131_v13, %v130_v5  ;;  %v218_v21 = vcombine.high %v397_v22, %v397_v22  ;;  %v219_v26 = vcombine.high %v399_v23, %v399_v23 }
  0x18   :  { %v138_v27 = vrot.slane %v137_v18, 1  ;;  %v148_v28 = vcombine.low %v90_v10, %v97_v14  ;;  %v149_v29 = vcombine.low %v104_v11, %v111_v15  ;;  %v235_v30 = vcombine.high %v401_v24, %v401_v24 }
  0x19   :  { %v150_v31 = vcombine.low %v118_v16, %v125_v19  ;;  %v236_v32 = vcombine.high %v403_v25, %v403_v25  ;;  %v245_v33 = vsel %vm83_vm0, %v397_v22, 0.0  ;;  %v252_v34 = vsel %vm83_vm0, %v218_v21, 0.0 }
  0x1a   :  { %v139_v35 = vadd.f32 %v138_v27, %v137_v18  ;;  %v158_v36 = vrot.slane %v148_v28, %v395_v17  ;;  %v165_v37 = vrot.slane %v149_v29, %v395_v17  ;;  %v246_v38 = vrot.slane %v245_v33, 4 }
  0x1b   :  { %v172_v39 = vrot.slane %v150_v31, %v395_v17  ;;  %v253_v40 = vrot.slane %v252_v34, 4  ;;  %v259_v41 = vsel %vm83_vm0, %v399_v23, 0.0  ;;  %v266_v42 = vsel %vm83_vm0, %v219_v26, 0.0 }
  0x1c   :  { %v151_v43 = vcombine.low %v132_v20, %v139_v35  ;;  %v180_v44 = vcombine.low %v158_v36, %v165_v37  ;;  %v247_v45 = vadd.f32 %v246_v38, %v245_v33  ;;  %v260_v22 = vrot.slane %v259_v41, 4 }
  0x1d   :  { %v254_v46 = vadd.f32 %v253_v40, %v252_v34  ;;  %v267_v47 = vrot.slane %v266_v42, 4  ;;  %v273_v48 = vsel %vm83_vm0, %v401_v24, 0.0  ;;  %v280_v49 = vsel %vm83_vm0, %v235_v30, 0.0 }
  0x1e   :  { %v179_v50 = vrot.slane %v151_v43, %v395_v17  ;;  %v188_v51 = vrot.slane %v180_v44, %v395_v17  ;;  %v248_v52 = vrot.slane %v247_v45, 2  ;;  %v261_v53 = vadd.f32 %v260_v22, %v259_v41 }
  0x1f   :  { %v255_v23 = vrot.slane %v254_v46, 2  ;;  %v268_v54 = vadd.f32 %v267_v47, %v266_v42  ;;  %v274_v55 = vrot.slane %v273_v48, 4  ;;  %v281_v56 = vrot.slane %v280_v49, 4 }
  0x20   :  { %v181_v57 = vcombine.low %v172_v39, %v179_v50  ;;  %v249_v58 = vadd.f32 %v248_v52, %v247_v45  ;;  %v262_v59 = vrot.slane %v261_v53, 2  ;;  %v287_v60 = vsel %vm83_vm0, %v403_v25, 0.0 }
  0x21   :  { %v256_v61 = vadd.f32 %v255_v23, %v254_v46  ;;  %v269_v24 = vrot.slane %v268_v54, 2  ;;  %v275_v62 = vadd.f32 %v274_v55, %v273_v48  ;;  %v282_v63 = vadd.f32 %v281_v56, %v280_v49 }
  0x22   :  { %v195_v0 = vrot.slane %v181_v57, %v395_v17  ;;  %v250_v1 = vrot.slane %v249_v58, 1  ;;  %v263_v2 = vadd.f32 %v262_v59, %v261_v53  ;;  %v288_v3 = vrot.slane %v287_v60, 4 }
  0x23   :  { %v257_v4 = vrot.slane %v256_v61, 1  ;;  %v270_v5 = vadd.f32 %v269_v24, %v268_v54  ;;  %v276_v6 = vrot.slane %v275_v62, 2  ;;  %v283_v7 = vrot.slane %v282_v63, 2 }
  0x24   :  { %v196_v8 = vcombine.low %v188_v51, %v195_v0  ;;  %v264_v9 = vrot.slane %v263_v2, 1  ;;  %v289_v10 = vadd.f32 %v288_v3, %v287_v60  ;;  %v251_v11 = vadd.f32 %v250_v1, %v249_v58 }
  0x25   :  { %v271_v12 = vrot.slane %v270_v5, 1  ;;  %v277_v13 = vadd.f32 %v276_v6, %v275_v62  ;;  %v284_v25 = vadd.f32 %v283_v7, %v282_v63  ;;  %v258_v14 = vadd.f32 %v257_v4, %v256_v61 }
  0x26   :  { %198 = vst [vmem:[%s452_s1] sm:$0xff] %v196_v8  ;;  %v265_v15 = vadd.f32 %v264_v9, %v263_v2  ;;  %v290_v16 = vrot.slane %v289_v10, 2  ;;  %v294_v18 = vsel %vm83_vm0, %v236_v32, 0.0 }
  0x27   :  { %v272_v19 = vadd.f32 %v271_v12, %v270_v5  ;;  %v278_v20 = vrot.slane %v277_v13, 1  ;;  %v285_v21 = vrot.slane %v284_v25, 1  ;;  %v295_v26 = vrot.slane %v294_v18, 4 }
  0x28   :  { %v291_v27 = vadd.f32 %v290_v16, %v289_v10  ;;  %v309_v30 = vcombine.low %v251_v11, %v258_v14 }
  0x29   :  { %v296_v28 = vadd.f32 %v295_v26, %v294_v18  ;;  %v279_v29 = vadd.f32 %v278_v20, %v277_v13  ;;  %v286_v31 = vadd.f32 %v285_v21, %v284_v25  ;;  %v310_v35 = vcombine.low %v265_v15, %v272_v19 }
  0x2a   :  { %v292_v33 = vrot.slane %v291_v27, 1  ;;  %v319_v37 = vrot.slane %v309_v30, %v395_v17 }
  0x2b   :  { %v297_v34 = vrot.slane %v296_v28, 2  ;;  %v311_v40 = vcombine.low %v279_v29, %v286_v31  ;;  %v326_v32 = vrot.slane %v310_v35, %v395_v17 }
  0x2c   :  { %v293_v38 = vadd.f32 %v292_v33, %v291_v27 }
  0x2d   :  { %v298_v36 = vadd.f32 %v297_v34, %v296_v28  ;;  %v333_v43 = vrot.slane %v311_v40, %v395_v17  ;;  %v341_v44 = vcombine.low %v319_v37, %v326_v32 }
  0x2f   :  { %v299_v39 = vrot.slane %v298_v36, 1  ;;  %v349_v46 = vrot.slane %v341_v44, %v395_v17 }
  0x31   :  { %v300_v41 = vadd.f32 %v299_v39, %v298_v36 }
  0x33   :  { %v312_v42 = vcombine.low %v293_v38, %v300_v41 }
  0x35   :  { %v340_v45 = vrot.slane %v312_v42, %v395_v17 }
  0x37   :  { %v342_v22 = vcombine.low %v333_v43, %v340_v45 }
  0x39   :  { %v356_v47 = vrot.slane %v342_v22, %v395_v17 }
  0x3b   :  { %v357_v48 = vcombine.low %v349_v46, %v356_v47 }
  0x3d   :  { %359 = vst [vmem:[%s453_s2] sm:$0xff] %v357_v48 }

// kernel: classifier_forward.3
= control target key start
LH: loop header
LB: loop body
LE: loop exit
PB: predicated region body
PF: predicated region fallthrough
CT: control target
= control target key end

     0   :  { %v38_v17 = vlaneseq  ;;  %v1092_v48 = vmov 1983009808   ;;  %s1344_s0 = inlined_call_operand.vmem [shape: bf16[2,1024], index: 0, kind: input, shape index: {}]   ;;  %s1345_s1 = inlined_call_operand.vmem [shape: f32[1,1024], index: 1, kind: input, shape index: {}]   ;;  %s1346_s2 = inlined_call_operand.vmem [shape: bf16[1024,128], index: 2, kind: input, shape index: {}]   ;;  %s1347_s3 = inlined_call_operand.vmem [shape: f32[1,128], index: 3, kind: input, shape index: {}]   ;;  %s1348_s4 = inlined_call_operand.hbm [shape: f32[2,128], index: 4, kind: output, shape index: {}]  }
   0x1   :  { %v1004_v0 = vld [vmem:[%s1346_s2 + $0x40] sm:$0xff]   ;;  %v1008_v4 = vld [vmem:[%s1346_s2 + $0x48] sm:$0xff]   ;;  %v1012_v8 = vld [vmem:[%s1346_s2 + $0x50] sm:$0xff]   ;;  %v73_v49 = vunpack.c.l.s4 %v1092_v48 }
   0x2   :  { %v1005_v1 = vld [vmem:[%s1346_s2 + $0xc0] sm:$0xff]   ;;  %914 = vmatprep.subr.bf16.mxu0 %v1004_v0  ;;  %v1009_v5 = vld [vmem:[%s1346_s2 + $0xc8] sm:$0xff]   ;;  %v1013_v9 = vld [vmem:[%s1346_s2 + $0xd0] sm:$0xff]   ;;  %v39_v22 = vshrl.u32 %v38_v17, 7 }
   0x3   :  { %v1006_v2 = vld [vmem:[%s1346_s2] sm:$0xff]   ;;  %936 = vmatprep.subr.bf16.mxu1 %v1005_v1  ;;  %v1010_v6 = vld [vmem:[%s1346_s2 + $0x8] sm:$0xff]   ;;  %v1014_v10 = vld [vmem:[%s1346_s2 + $0x10] sm:$0xff]   ;;  %v74_v58 = vunpack.c.0.s8 %v73_v49 }
   0x4   :  { %v1007_v3 = vld [vmem:[%s1346_s2 + $0x80] sm:$0xff]   ;;  %915 = vmatpush3.bf16.msra.mxu0 %v1006_v2  ;;  %v1011_v7 = vld [vmem:[%s1346_s2 + $0x88] sm:$0xff]   ;;  %v1015_v11 = vld [vmem:[%s1346_s2 + $0x90] sm:$0xff]   ;;  %v40_v27 = vsub.s32 0, %v39_v22  ;;  %v44_v29 = vsub.s32 1, %v39_v22  ;;  %v48_v31 = vsub.s32 2, %v39_v22 }
   0x5   :  { %937 = vmatpush3.bf16.msra.mxu1 %v1007_v3  ;;  %916 = vmatprep.subr.bf16.mxu0 %v1008_v4  ;;  %v1016_v12 = vld [vmem:[%s1346_s2 + $0x58] sm:$0xff]   ;;  %v1020_v16 = vld [vmem:[%s1346_s2 + $0x60] sm:$0xff]   ;;  %v1024_v21 = vld [vmem:[%s1346_s2 + $0x68] sm:$0xff]   ;;  %v52_v33 = vsub.s32 3, %v39_v22  ;;  %v56_v35 = vsub.s32 4, %v39_v22  ;;  %v60_v37 = vsub.s32 5, %v39_v22  ;;  %v77_v61 = vsub.s32 %v74_v58, %v39_v22 }
   0x6   :  { %938 = vmatprep.subr.bf16.mxu1 %v1009_v5  ;;  %v1017_v13 = vld [vmem:[%s1346_s2 + $0xd8] sm:$0xff]   ;;  %v1021_v18 = vld [vmem:[%s1346_s2 + $0xe0] sm:$0xff]   ;;  %v1025_v23 = vld [vmem:[%s1346_s2 + $0xe8] sm:$0xff]   ;;  %v64_v39 = vsub.s32 6, %v39_v22  ;;  %v68_v41 = vsub.s32 7, %v39_v22 }
   0x7   :  { %v1018_v14 = vld [vmem:[%s1346_s2 + $0x18] sm:$0xff]   ;;  %v1022_v19 = vld [vmem:[%s1346_s2 + $0x20] sm:$0xff]   ;;  %v1026_v24 = vld [vmem:[%s1346_s2 + $0x28] sm:$0xff]  }
   0x8   :  { %917 = vmatpush3.bf16.msra.mxu0 %v1010_v6  ;;  %v1019_v15 = vld [vmem:[%s1346_s2 + $0x98] sm:$0xff]   ;;  %v1023_v20 = vld [vmem:[%s1346_s2 + $0xa0] sm:$0xff]   ;;  %v1027_v25 = vld [vmem:[%s1346_s2 + $0xa8] sm:$0xff]  }
   0x9   :  { %939 = vmatpush3.bf16.msra.mxu1 %v1011_v7  ;;  %918 = vmatprep.subr.bf16.mxu0 %v1012_v8  ;;  %v1028_v26 = vld [vmem:[%s1346_s2 + $0x70] sm:$0xff]   ;;  %v1032_v34 = vld [vmem:[%s1346_s2 + $0x78] sm:$0xff]   ;;  %v33_v42 = vld [vmem:[%s1345_s1] sm:$0xff] }
   0xa   :  { %940 = vmatprep.subr.bf16.mxu1 %v1013_v9  ;;  %v1029_v28 = vld [vmem:[%s1346_s2 + $0xf0] sm:$0xff]   ;;  %v1033_v36 = vld [vmem:[%s1346_s2 + $0xf8] sm:$0xff]   ;;  %v41_v43 = vrot.slane %v33_v42, %v40_v27  ;;  %v45_v44 = vrot.slane %v33_v42, %v44_v29  ;;  %v1036_v45 = vld [vmem:[%s1346_s2 + $0x140] sm:$0xff]   ;;  %v49_v46 = vrot.slane %v33_v42, %v48_v31  ;;  %v53_v47 = vrot.slane %v33_v42, %v52_v33 }
   0xb   :  { %v1030_v30 = vld [vmem:[%s1346_s2 + $0x30] sm:$0xff]   ;;  %v1034_v38 = vld [vmem:[%s1346_s2 + $0x38] sm:$0xff]   ;;  %v1037_v50 = vld [vmem:[%s1346_s2 + $0x1c0] sm:$0xff]   ;;  %v57_v51 = vrot.slane %v33_v42, %v56_v35  ;;  %v61_v52 = vrot.slane %v33_v42, %v60_v37  ;;  %v65_v53 = vrot.slane %v33_v42, %v64_v39  ;;  %v69_v54 = vrot.slane %v33_v42, %v68_v41 }
   0xc   :  { %919 = vmatpush3.bf16.msra.mxu0 %v1014_v10  ;;  %v1031_v32 = vld [vmem:[%s1346_s2 + $0xb0] sm:$0xff]   ;;  %v1035_v40 = vld [vmem:[%s1346_s2 + $0xb8] sm:$0xff]   ;;  %v34_v55 = vld [vmem:[%s1344_s0] sm:$0xff]  ;;  %v70_v56 = vcombine.low %v41_v43, %v45_v44  ;;  %v71_v57 = vcombine.low %v49_v46, %v53_v47 }
   0xd   :  { %941 = vmatpush3.bf16.msra.mxu1 %v1015_v11  ;;  %920 = vmatprep.subr.bf16.mxu0 %v1016_v12  ;;  %v87_v59 = vcombine.low %v57_v51, %v61_v52  ;;  %v88_v60 = vcombine.low %v65_v53, %v69_v54  ;;  %v35_v62 = vunpack.c.l.bf16 %v34_v55  ;;  %v36_v63 = vunpack.c.h.bf16 %v34_v55  ;;  %v1044_v29 = vld [vmem:[%s1346_s2 + $0x150] sm:$0xff]   ;;  %v1048_v33 = vld [vmem:[%s1346_s2 + $0x158] sm:$0xff]   ;;  %v1052_v37 = vld [vmem:[%s1346_s2 + $0x160] sm:$0xff]  }
   0xe   :  { %942 = vmatprep.subr.bf16.mxu1 %v1017_v13  ;;  %v78_v0 = vrot.slane %v70_v56, %v77_v61  ;;  %v85_v1 = vrot.slane %v71_v57, %v77_v61  ;;  %v1045_v31 = vld [vmem:[%s1346_s2 + $0x1d0] sm:$0xff]   ;;  %v1049_v35 = vld [vmem:[%s1346_s2 + $0x1d8] sm:$0xff]  }
   0xf   :  { %v95_v2 = vrot.slane %v87_v59, %v77_v61  ;;  %v102_v3 = vrot.slane %v88_v60, %v77_v61 }
  0x10   :  { %921 = vmatpush3.bf16.msra.mxu0 %v1018_v14  ;;  %v86_v4 = vcombine.low %v78_v0, %v85_v1 }
  0x11   :  { %943 = vmatpush3.bf16.msra.mxu1 %v1019_v15  ;;  %922 = vmatprep.subr.bf16.mxu0 %v1020_v16  ;;  %v103_v5 = vcombine.low %v95_v2, %v102_v3 }
  0x12   :  { %944 = vmatprep.subr.bf16.mxu1 %v1021_v18  ;;  %v106_v6 = vmul.f32 %v86_v4, %v35_v62 }
  0x13   :  { %v107_v7 = vmul.f32 %v103_v5, %v36_v63 }
  0x14   :  { %923 = vmatpush3.bf16.msra.mxu0 %v1022_v19  ;;  %v117_v8 = vrot.slane %v106_v6, %v77_v61  ;;  %v110_v9 = vcombine.high %v106_v6, %v106_v6  ;;  %v1038_v19 = vld [vmem:[%s1346_s2 + $0x100] sm:$0xff]  }
  0x15   :  { %945 = vmatpush3.bf16.msra.mxu1 %v1023_v20  ;;  %924 = vmatprep.subr.bf16.mxu0 %v1024_v21  ;;  %v1227_v10 = vrot.slane %v107_v7, %v77_v61  ;;  %v127_v11 = vcombine.high %v107_v7, %v107_v7  ;;  %v1040_v21 = vld [vmem:[%s1346_s2 + $0x148] sm:$0xff]  }
  0x16   :  { %946 = vmatprep.subr.bf16.mxu1 %v1025_v23  ;;  %v125_v12 = vcombine.high %v117_v8, %v117_v8  ;;  %v124_v13 = vrot.slane %v110_v9, %v77_v61  ;;  %v152_v15 = vpack.c.bf16 %v117_v8, %v117_v8 }
  0x17   :  { %v142_v14 = vcombine.high %v1227_v10, %v1227_v10  ;;  %v1231_v16 = vrot.slane %v127_v11, %v77_v61 }
  0x18   :  { %925 = vmatpush3.bf16.msra.mxu0 %v1026_v24  ;;  %v153_v17 = vpack.c.bf16 %v125_v12, %v125_v12  ;;  %v126_v18 = vcombine.high %v124_v13, %v124_v13  ;;  %v154_v20 = vpack.c.bf16 %v124_v13, %v124_v13  ;;  %v1039_v24 = vld [vmem:[%s1346_s2 + $0x180] sm:$0xff]  }
  0x19   :  { %947 = vmatpush3.bf16.msra.mxu1 %v1027_v25  ;;  %926 = vmatprep.subr.bf16.mxu0 %v1028_v26  ;;  %v143_v22 = vcombine.high %v1231_v16, %v1231_v16  ;;  %v157_v25 = vpack.c.bf16 %v142_v14, %v142_v14  ;;  %v1041_v26 = vld [vmem:[%s1346_s2 + $0x1c8] sm:$0xff]  }
  0x1a   :  { %948 = vmatprep.subr.bf16.mxu1 %v1029_v28  ;;  %705 = vmatprep.mubr.bf16.mxu0 %v153_v17  ;;  %v155_v23 = vpack.c.bf16 %v126_v18, %v126_v18  ;;  %v1042_v28 = vld [vmem:[%s1346_s2 + $0x108] sm:$0xff]  }
  0x1b   :  { %v159_v27 = vpack.c.bf16 %v143_v22, %v143_v22 }
  0x1c   :  { %927 = vmatpush3.bf16.msra.mxu0 %v1030_v30  ;;  %745 = vmatprep.mubr.bf16.mxu1 %v155_v23  ;;  %v1043_v30 = vld [vmem:[%s1346_s2 + $0x188] sm:$0xff]  }
  0x1d   :  { %949 = vmatpush3.bf16.msra.mxu1 %v1031_v32  ;;  %928 = vmatprep.subr.bf16.mxu0 %v1032_v34  ;;  %v1046_v32 = vld [vmem:[%s1346_s2 + $0x110] sm:$0xff]  }
  0x1e   :  { %950 = vmatprep.subr.bf16.mxu1 %v1033_v36  ;;  %v1047_v34 = vld [vmem:[%s1346_s2 + $0x190] sm:$0xff]   ;;  %v1050_v36 = vld [vmem:[%s1346_s2 + $0x118] sm:$0xff]  }
  0x20   :  { %929 = vmatpush3.bf16.msra.mxu0 %v1034_v38  ;;  %v1051_v38 = vld [vmem:[%s1346_s2 + $0x198] sm:$0xff]  }
  0x21   :  { %951 = vmatpush3.bf16.msra.mxu1 %v1035_v40  ;;  %958 = vmatprep.subr.bf16.mxu0 %v1036_v45 }
  0x22   :  { %980 = vmatprep.subr.bf16.mxu1 %v1037_v50 }
  0x23   :  { %706 = vmatmul.mubr.bf16.vlgmr.msra.gmra.mrb[0].mxu0 %v152_v15 }
  0x24   :  { %959 = vmatpush3.bf16.msra.mxu0 %v1038_v19  ;;  %746 = vmatmul.mubr.bf16.vlgmr.msra.gmra.mrb[0].mxu1 %v154_v20 }
  0x25   :  { %960 = vmatprep.subr.bf16.mxu0 %v1040_v21  ;;  %981 = vmatpush3.bf16.msra.mxu1 %v1039_v24 }
  0x26   :  { %785 = vmatprep.mubr.bf16.mxu0 %v157_v25  ;;  %982 = vmatprep.subr.bf16.mxu1 %v1041_v26 }
  0x27   :  { %825 = vmatprep.mubr.bf16.mxu1 %v159_v27 }
  0x28   :  { %961 = vmatpush3.bf16.msra.mxu0 %v1042_v28 }
  0x29   :  { %962 = vmatprep.subr.bf16.mxu0 %v1044_v29  ;;  %983 = vmatpush3.bf16.msra.mxu1 %v1043_v30 }
  0x2a   :  { %984 = vmatprep.subr.bf16.mxu1 %v1045_v31 }
  0x2c   :  { %963 = vmatpush3.bf16.msra.mxu0 %v1046_v32 }
  0x2d   :  { %964 = vmatprep.subr.bf16.mxu0 %v1048_v33  ;;  %985 = vmatpush3.bf16.msra.mxu1 %v1047_v34 }
  0x2e   :  { %9 = vsyncpa [#allocation3], 0  ;;  %986 = vmatprep.subr.bf16.mxu1 %v1049_v35  ;;  %v1053_v39 = vld [vmem:[%s1346_s2 + $0x1e0] sm:$0xff]   ;;  %v1056_v41 = vld [vmem:[%s1346_s2 + $0x168] sm:$0xff]   ;;  %v156_v54 = vpack.c.bf16 %v1227_v10, %v1227_v10  ;;  %v158_v55 = vpack.c.bf16 %v1231_v16, %v1231_v16 }
  0x2f   :  { %v1054_v40 = vld [vmem:[%s1346_s2 + $0x120] sm:$0xff]   ;;  %v1057_v43 = vld [vmem:[%s1346_s2 + $0x1e8] sm:$0xff]   ;;  %v1060_v45 = vld [vmem:[%s1346_s2 + $0x170] sm:$0xff]  }
  0x30   :  { %965 = vmatpush3.bf16.msra.mxu0 %v1050_v36  ;;  %v1055_v42 = vld [vmem:[%s1346_s2 + $0x1a0] sm:$0xff]   ;;  %v1058_v44 = vld [vmem:[%s1346_s2 + $0x128] sm:$0xff]   ;;  %v1061_v47 = vld [vmem:[%s1346_s2 + $0x1f0] sm:$0xff]  }
  0x31   :  { %966 = vmatprep.subr.bf16.mxu0 %v1052_v37  ;;  %987 = vmatpush3.bf16.msra.mxu1 %v1051_v38  ;;  %v1059_v46 = vld [vmem:[%s1346_s2 + $0x1a8] sm:$0xff]   ;;  %v1062_v48 = vld [vmem:[%s1346_s2 + $0x130] sm:$0xff]   ;;  %v1064_v49 = vld [vmem:[%s1346_s2 + $0x178] sm:$0xff]  }
  0x32   :  { %988 = vmatprep.subr.bf16.mxu1 %v1053_v39  ;;  %v1063_v50 = vld [vmem:[%s1346_s2 + $0x1b0] sm:$0xff]   ;;  %v1065_v51 = vld [vmem:[%s1346_s2 + $0x1f8] sm:$0xff]   ;;  %v849_v56 = vld [vmem:[%s1347_s3] ss:$0 sm:$0xff] }
  0x33   :  { %v1066_v52 = vld [vmem:[%s1346_s2 + $0x138] sm:$0xff]   ;;  %30 = vst [vmem:[#allocation2] sm:$0x3] %v849_v56 }
  0x34   :  { %967 = vmatpush3.bf16.msra.mxu0 %v1054_v40  ;;  %v1067_v53 = vld [vmem:[%s1346_s2 + $0x1b8] sm:$0xff]   ;;  %s1093_s2 = smov [#allocation2]  }
  0x35   :  { %968 = vmatprep.subr.bf16.mxu0 %v1056_v41  ;;  %989 = vmatpush3.bf16.msra.mxu1 %v1055_v42  ;;  %s841_s3 = sshll.u32 %s1093_s2, 4  ;;  %s842_s3 = int_to_ptr.vmem [resolvable:$true] %s841_s3 }
  0x36   :  { %990 = vmatprep.subr.bf16.mxu1 %v1057_v43  ;;  %s1068_s13 = scalar_lea.vmem %s842_s3, 32  ;;  %p1073_p1 = scmp.lt.s32.totalorder %s842_s3, %s842_s3 }
  0x37   :  { %p1069_p0 = scmp.ne.s32.totalorder %s842_s3, %s1068_s13  ;;  %p1074_p2 = scmp.lt.s32.totalorder %s1068_s13, %s1068_s13 }
  0x38   :  { %969 = vmatpush3.bf16.msra.mxu0 %v1058_v44 }
  0x39   :  { %970 = vmatprep.subr.bf16.mxu0 %v1060_v45  ;;  %991 = vmatpush3.bf16.msra.mxu1 %v1059_v46  ;;  %p1075_p3 = por %p1074_p2, %p1073_p1 }
  0x3a   :  { %992 = vmatprep.subr.bf16.mxu1 %v1061_v47  ;;  %v160_v15 = vld [vmem:[#allocation2] sm:$0x3] }
  0x3b   :  { %p1076_p4 = pnand %p1075_p3, %p1069_p0 }
  0x3c   :  { %971 = vmatpush3.bf16.msra.mxu0 %v1062_v48 }
  0x3d   :  { %972 = vmatprep.subr.bf16.mxu0 %v1064_v49  ;;  %993 = vmatpush3.bf16.msra.mxu1 %v1063_v50 }
  0x3e   :  { %994 = vmatprep.subr.bf16.mxu1 %v1065_v51 }
  0x40   :  { %973 = vmatpush3.bf16.msra.mxu0 %v1066_v52 }
  0x41   :  { %995 = vmatpush3.bf16.msra.mxu1 %v1067_v53 }
  0x43   :  { %786 = vmatmul.mubr.bf16.vlgmr.msra.gmra.mrb[4].mxu0 %v156_v54 }
  0x44   :  { %826 = vmatmul.mubr.bf16.vlgmr.msra.gmra.mrb[4].mxu1 %v158_v55 }
  0xf6   :  { %v930_v57 = vpop.f32.mrb[0].mxu0 }
  0xf7   :  { %v931_v58 = vpop.f32.mrb[1].mxu0  ;;  %v952_v59 = vpop.f32.mrb[0].mxu1 }
  0xf8   :  { %v932_v60 = vadd.f32 %v931_v58, %v930_v57  ;;  %v933_v61 = vpop.f32.mrb[2].mxu0  ;;  %v953_v62 = vpop.f32.mrb[1].mxu1 }
  0xf9   :  { %v934_v63 = vpop.f32.mrb[3].mxu0  ;;  %v954_v0 = vadd.f32 %v953_v62, %v952_v59  ;;  %v955_v1 = vpop.f32.mrb[2].mxu1 }
  0xfa   :  { %v956_v2 = vpop.f32.mrb[3].mxu1 }
  0xfb   :  { %v748_v3 = vadd.f32 %v954_v0, %v932_v60 }
 0x116   :  { %v974_v4 = vpop.f32.mrb[4].mxu0 }
 0x117   :  { %v975_v5 = vpop.f32.mrb[5].mxu0  ;;  %v996_v6 = vpop.f32.mrb[4].mxu1 }
 0x118   :  { %v976_v7 = vadd.f32 %v975_v5, %v974_v4  ;;  %v977_v8 = vpop.f32.mrb[6].mxu0  ;;  %v997_v9 = vpop.f32.mrb[5].mxu1 }
 0x119   :  { %v978_v10 = vpop.f32.mrb[7].mxu0  ;;  %v998_v12 = vadd.f32 %v997_v9, %v996_v6  ;;  %v999_v13 = vpop.f32.mrb[6].mxu1 }
 0x11a   :  { %v788_v11 = vadd.f32 %v976_v7, %v748_v3  ;;  %v1000_v14 = vpop.f32.mrb[7].mxu1 }
 0x11c   :  { %v828_v16 = vadd.f32 %v998_v12, %v788_v11 }
 0x11e   :  { %v833_v17 = vadd.f32 %v828_v16, %v160_v15 }
 0x120   :  { %834 = vst [vmem:[#allocation2] sm:$0x3] %v833_v17 }
 0x121   :  { %1079 = shalt.err (!%p1076_p4)
}
 0x122   :  { %s1080_s16 = scalar_lea.hbm %s1348_s4, 32 }
 0x123   :  { %p1081_p5 = scmp.ne.s32.totalorder %s1348_s4, %s1080_s16  ;;  %p1084_p6 = scmp.lt.u32.totalorder %s1080_s16, %s1348_s4 }
 0x125   :  { %p1086_p7 = pnand %p1084_p6, %p1081_p5 }
 0x127   :  { %1089 = shalt.err (!%p1086_p7)
}
 0x128   :  { %844 = dma.vmem_to_hbm [thread:$0]  %s842_s3, 32, %s1348_s4, [#allocation3]  }
 0x129   :  { %1090 = dma.done.wait [#allocation3], 32  }
 0x12a   :  { %1091 = vsyncadd [#allocation3], 4294967264 }
 0x12b   :  { %848 = vsyncpa [#allocation3], 1 }

</bundles_post_ra>
